<compile_context>
chip_gen: v6e
topology: v6e:2x2x1
jax: 0.10.0
libtpu: 0.0.40
codegen_flags: <defaults>
</compile_context>

<pallas_src>
import jax
import jax.numpy as jnp
from jax import lax
from jax.experimental import pallas as pl
from jax.experimental.pallas import tpu as pltpu


def _round_up(n, m):
    return ((n + m - 1) // m) * m


def valuenet_kernel(x_ref, w1_ref, b1w2_ref, b2_ref, o_ref):
    # fc1 on the MXU, contracting on D_in with x in its native (TB, D_in)
    # layout: (H, D_in) . (TB, D_in)^T -> (H, TB). Batch lands on lanes.
    h = lax.dot_general(
        w1_ref[...], x_ref[...],
        dimension_numbers=(((1,), (1,)), ((), ())),
        preferred_element_type=jnp.float32,
    )
    bw = b1w2_ref[...]                 # (H, 2): column 0 = b1, column 1 = w2
    b1 = bw[:, 0:1]
    w2 = bw[:, 1:2]
    h = jnp.maximum(h + b1, 0.0)       # bias broadcast across TB lanes + ReLU (VPU)
    # fc2 (output width 1): VPU multiply + cross-sublane reduction instead of
    # a 1-wide MXU matmul. Result is already lane-dense: (1, TB).
    out = jnp.sum(h * w2, axis=0, keepdims=True)
    o_ref[...] = (out + b2_ref[0]).astype(o_ref.dtype)


def value_net_forward(x, w1, b1, w2, b2, *, block_b=8192):
    """Fused ValueNet forward.

    x : (B, D_in) f32
    w1: (H, D_in) f32   (torch fc1.weight layout: out_features x in_features)
    b1: (H, 1)    f32
    w2: (H, 1)    f32   (torch fc2.weight transposed)
    b2: (1,)      f32
    returns (B, 1) f32
    """
    B, D_in = x.shape
    H = w1.shape[0]

    block_b = _round_up(block_b, 128)
    b_ceil = _round_up(B, 128)
    # Prefer at least 2 grid steps when B allows it: v7x shards the
    # "parallel" grid axis across its two TensorCores (no-op on v5e/v6e).
    tb_two = _round_up(pl.cdiv(b_ceil, 2), 128)
    TB = max(128, min(block_b, tb_two))
    B_pad = _round_up(B, TB)

    # x stays in its native (B, D_in) layout; only pad the batch axis when it
    # does not divide the tile. No wrapper-side transpose.
    if B_pad != B:
        x = jnp.pad(x, ((0, B_pad - B), (0, 0)))

    # Pack the two tiny per-hidden-unit vectors into one resident VMEM input.
    b1w2 = jnp.concatenate([b1.reshape(H, 1), w2.reshape(H, 1)], axis=1)

    out = pl.pallas_call(
        valuenet_kernel,
        out_shape=jax.ShapeDtypeStruct((1, B_pad), jnp.float32),
        grid=(B_pad // TB,),
        in_specs=[
            pl.BlockSpec((TB, D_in), lambda i: (i, 0)),         # x tile (pipelined)
            pl.BlockSpec((H, D_in), lambda i: (0, 0)),          # w1 resident
            pl.BlockSpec((H, 2), lambda i: (0, 0)),             # [b1 | w2] resident
            pl.BlockSpec(memory_space=pltpu.MemorySpace.SMEM),  # b2 scalar
        ],
        out_specs=pl.BlockSpec((1, TB), lambda i: (0, i)),      # lane-dense store
        compiler_params=pltpu.CompilerParams(
            dimension_semantics=("parallel",),
        ),
    )(x, w1, b1w2, b2)

    # Module semantics: (B, 1). Padded columns hold garbage and are sliced off.
    return out[0, :B].reshape(B, 1)


def init_params(key, input_dim, hidden_dim):
    """Deterministic init mimicking torch.nn.Linear's uniform(-1/sqrt(fan_in))."""
    k1, k2, k3, k4 = jax.random.split(key, 4)
    bound1 = 1.0 / jnp.sqrt(input_dim)
    bound2 = 1.0 / jnp.sqrt(hidden_dim)
    # fc1.weight in torch layout (out_features, in_features).
    w1 = jax.random.uniform(k1, (hidden_dim, input_dim), jnp.float32, -bound1, bound1)
    b1 = jax.random.uniform(k2, (hidden_dim, 1), jnp.float32, -bound1, bound1)
    # fc2.weight transposed to a column: (hidden_dim, 1).
    w2 = jax.random.uniform(k3, (hidden_dim, 1), jnp.float32, -bound2, bound2)
    b2 = jax.random.uniform(k4, (1,), jnp.float32, -bound2, bound2)
    return w1, b1, w2, b2


if __name__ == "__main__":
    key = jax.random.PRNGKey(0)
    k_x, k_p = jax.random.split(key)

    batch = 8
    input_dim = 16
    hidden_dim = 32

    x = jax.random.normal(k_x, (batch, input_dim), jnp.float32)
    w1, b1, w2, b2 = init_params(k_p, input_dim, hidden_dim)

    out = value_net_forward(x, w1, b1, w2, b2)
    out = jax.block_until_ready(out)

    # Pure-JAX reference of the same forward pass (torch semantics).
    ref = jnp.maximum(x @ w1.T + b1.T, 0.0) @ w2 + b2[None, :]
    assert out.shape == (batch, 1)
    assert jnp.allclose(out, ref, atol=1e-5, rtol=1e-5)

    print("KERNEL_OK")
</pallas_src>

<mosaic_0001>
module attributes {stable_mosaic.version = 11 : i64} {
  func.func @valuenet_kernel(%arg0: i32, %arg1: memref<128x16xf32, #tpu.memory_space<vmem>>, %arg2: memref<32x16xf32, #tpu.memory_space<vmem>>, %arg3: memref<32x2xf32, #tpu.memory_space<vmem>>, %arg4: memref<1xf32, #tpu.memory_space<smem>>, %arg5: memref<1x128xf32, #tpu.memory_space<vmem>>) attributes {dimension_semantics = [#tpu.dimension_semantics<parallel>], iteration_bounds = array<i64: 1>, scalar_prefetch = 0 : i64, scratch_operands = 0 : i64, tpu.core_type = #tpu.core_type<tc>, window_params = [{transform_indices = @transform_0, window_bounds = array<i64: 128, 16>}, {pipeline_mode = #tpu.pipeline_mode<synchronous>, transform_indices = @transform_1, window_bounds = array<i64: 32, 16>}, {pipeline_mode = #tpu.pipeline_mode<synchronous>, transform_indices = @transform_2, window_bounds = array<i64: 32, 2>}, {transform_indices = @transform_3, window_bounds = array<i64: 1>}, {transform_indices = @transform_4, window_bounds = array<i64: 1, 128>}]} {
    %c0 = arith.constant 0 : index
    %c0_0 = arith.constant 0 : index
    %0 = vector.load %arg2[%c0, %c0_0] : memref<32x16xf32, #tpu.memory_space<vmem>>, vector<32x16xf32>
    %c0_1 = arith.constant 0 : index
    %c0_2 = arith.constant 0 : index
    %1 = vector.load %arg1[%c0_1, %c0_2] : memref<128x16xf32, #tpu.memory_space<vmem>>, vector<128x16xf32>
    %cst = arith.constant dense<0.000000e+00> : vector<32x128xf32>
    %2 = tpu.matmul %0, %1, %cst {dimension_numbers = #tpu.dot_dimension_numbers<[1], [1], [0], [0], [0, 0, 1, 0], [], []>} : vector<32x16xf32>, vector<128x16xf32>, vector<32x128xf32> -> vector<32x128xf32>
    %c0_3 = arith.constant 0 : index
    %c0_4 = arith.constant 0 : index
    %3 = vector.load %arg3[%c0_3, %c0_4] : memref<32x2xf32, #tpu.memory_space<vmem>>, vector<32x2xf32>
    %4 = vector.extract_strided_slice %3 {offsets = [0, 0], sizes = [32, 1], strides = [1, 1]} : vector<32x2xf32> to vector<32x1xf32>
    %5 = vector.extract_strided_slice %3 {offsets = [0, 1], sizes = [32, 1], strides = [1, 1]} : vector<32x2xf32> to vector<32x1xf32>
    %6 = vector.broadcast %4 : vector<32x1xf32> to vector<32x128xf32>
    %7 = arith.addf %2, %6 : vector<32x128xf32>
    %cst_5 = arith.constant 0.000000e+00 : f32
    %8 = vector.broadcast %cst_5 : f32 to vector<32x128xf32>
    %9 = arith.maximumf %7, %8 : vector<32x128xf32>
    %10 = vector.broadcast %5 : vector<32x1xf32> to vector<32x128xf32>
    %11 = arith.mulf %9, %10 : vector<32x128xf32>
    %cst_6 = arith.constant dense<0.000000e+00> : vector<128xf32>
    %12 = vector.multi_reduction <add>, %11, %cst_6 [0] : vector<32x128xf32> to vector<128xf32>
    %13 = vector.shape_cast %12 : vector<128xf32> to vector<1x128xf32>
    %c0_7 = arith.constant 0 : index
    %14 = memref.load %arg4[%c0_7] : memref<1xf32, #tpu.memory_space<smem>>
    %15 = vector.broadcast %14 : f32 to vector<1x128xf32>
    %16 = arith.addf %13, %15 : vector<1x128xf32>
    %c0_8 = arith.constant 0 : index
    %c0_9 = arith.constant 0 : index
    %17 = vector.load %arg5[%c0_8, %c0_9] : memref<1x128xf32, #tpu.memory_space<vmem>>, vector<1x128xf32>
    tpu.vector_store %arg5[%c0_8, %c0_9], %16 {strides = array<i32>} : memref<1x128xf32, #tpu.memory_space<vmem>>, vector<1x128xf32>,
    return
  }
  func.func @transform_0(%arg0: i32) -> (i32, i32) {
    %c0_i32 = arith.constant 0 : i32
    %c0_i32_0 = arith.constant 0 : i32
    return %arg0, %c0_i32 : i32, i32
  }
  func.func @transform_1(%arg0: i32) -> (i32, i32) {
    %c0_i32 = arith.constant 0 : i32
    %c0_i32_0 = arith.constant 0 : i32
    %c0_i32_1 = arith.constant 0 : i32
    return %c0_i32, %c0_i32_0 : i32, i32
  }
  func.func @transform_2(%arg0: i32) -> (i32, i32) {
    %c0_i32 = arith.constant 0 : i32
    %c0_i32_0 = arith.constant 0 : i32
    %c0_i32_1 = arith.constant 0 : i32
    return %c0_i32, %c0_i32_0 : i32, i32
  }
  func.func @transform_3(%arg0: i32) -> i32 {
    %c0_i32 = arith.constant 0 : i32
    %c0_i32_0 = arith.constant 0 : i32
    return %c0_i32 : i32
  }
  func.func @transform_4(%arg0: i32) -> (i32, i32) {
    %c0_i32 = arith.constant 0 : i32
    %c0_i32_0 = arith.constant 0 : i32
    return %c0_i32, %arg0 : i32, i32
  }
}

</mosaic_0001>

<bundles_post_ra>
// kernel: tpu_custom_call.1
= control target key start
LH: loop header
LB: loop body
LE: loop exit
PB: predicated region body
PF: predicated region fallthrough
CT: control target
= control target key end

     0   :  { %vm63_vm0 = vcmask 130048   ;;  %v399_v3 = vmov 0   ;;  %s573_s0 = inlined_call_operand.vmem [shape: f32[128,16], index: 0, kind: input, shape index: {}]   ;;  %s574_s1 = inlined_call_operand.vmem [shape: f32[32,16], index: 1, kind: input, shape index: {}]   ;;  %s575_s2 = inlined_call_operand.vmem [shape: f32[32,2], index: 2, kind: input, shape index: {}]   ;;  %s576_s3 = inlined_call_operand.<no memory space> [shape: f32[1], index: 3, kind: input, shape index: {}]   ;;  %s577_s4 = inlined_call_operand.hbm [shape: f32[1,128], index: 4, kind: output, shape index: {}]  }
   0x1   :  { %v38_v0 = vld [vmem:[%s573_s0 + $0x78] sm:$0xff]  ;;  %v37_v1 = vld [vmem:[%s573_s0 + $0x70] sm:$0xff]  ;;  %v36_v2 = vld [vmem:[%s573_s0 + $0x68] sm:$0xff]  ;;  %374 = vset.pattern.permute.xlu1 %v399_v3  ;;  %373 = vset.pattern.permute.xlu0 %v399_v3 }
   0x2   :  { %300 = vmatprep.subr.msk.mxu0 %vm63_vm0, %v38_v0  ;;  %338 = vmatprep.subr.msk.mxu1 %vm63_vm0, %v38_v0  ;;  %v19_v4 = vld [vmem:[%s574_s1] sm:$0xff]  ;;  %v21_v5 = vld [vmem:[%s574_s1 + $0x10] sm:$0xff] }
   0x3   :  { %301 = vmatpush3.xpose.msk.msra.mxu0 %vm63_vm0, %v38_v0  ;;  %354 = vmatpush3.xpose.msk.msra.mxu1 %vm63_vm0, %v38_v0  ;;  %v41_v6 = vld [vmem:[%s575_s2 + $0x10] sm:$0xff]  ;;  %v39_v7 = vld [vmem:[%s575_s2] sm:$0xff] }
   0x4   :  { %302 = vmatprep.subr.msk.mxu0 %vm63_vm0, %v37_v1  ;;  %339 = vmatprep.subr.msk.mxu1 %vm63_vm0, %v37_v1  ;;  %v35_v8 = vld [vmem:[%s573_s0 + $0x60] sm:$0xff] }
   0x5   :  { %332 = vmatprep.mubr.msk.f32.mxu0 %vm63_vm0, %v19_v4  ;;  %335 = vmatprep.mubr.msk.f32.mxu1 %vm63_vm0, %v21_v5 }
   0x7   :  { %303 = vmatpush3.xpose.msk.msra.mxu0 %vm63_vm0, %v37_v1  ;;  %355 = vmatpush3.xpose.msk.msra.mxu1 %vm63_vm0, %v37_v1 }
   0x8   :  { %304 = vmatprep.subr.msk.mxu0 %vm63_vm0, %v36_v2  ;;  %340 = vmatprep.subr.msk.mxu1 %vm63_vm0, %v36_v2 }
   0x9   :  { %10 = vsyncpa [#allocation4], 0  ;;  %55 = vperm.xlu1 %374, %v41_v6   ;;  %45 = vperm.xlu0 %373, %v39_v7   ;;  %v42_v9 = vld [vmem:[%s575_s2 + $0x18] sm:$0xff]  ;;  %v40_v10 = vld [vmem:[%s575_s2 + $0x8] sm:$0xff]  ;;  %v400_v13 = vmov 1   ;;  %v243_v58 = vstv %s576_s3  ;;  %s401_s10 = smov [#allocation3]  }
   0xa   :  { %v34_v11 = vld [vmem:[%s573_s0 + $0x58] sm:$0xff]  ;;  %v33_v12 = vld [vmem:[%s573_s0 + $0x50] sm:$0xff]  ;;  %v32_v14 = vld [vmem:[%s573_s0 + $0x48] sm:$0xff]  ;;  %s252_s11 = sshll.u32 %s401_s10, 4  ;;  %s253_s11 = int_to_ptr.vmem [resolvable:$true] %s252_s11 }
   0xb   :  { %305 = vmatpush3.xpose.msk.msra.mxu0 %vm63_vm0, %v36_v2  ;;  %356 = vmatpush3.xpose.msk.msra.mxu1 %vm63_vm0, %v36_v2  ;;  %v31_v15 = vld [vmem:[%s573_s0 + $0x40] sm:$0xff]  ;;  %v30_v16 = vld [vmem:[%s573_s0 + $0x38] sm:$0xff]  ;;  %v29_v17 = vld [vmem:[%s573_s0 + $0x30] sm:$0xff]  ;;  %s377_s2 = scalar_lea.vmem %s253_s11, 16  ;;  %s381_s12 = scalar_lea.vmem %s253_s11, 32 }
   0xc   :  { %306 = vmatprep.subr.msk.mxu0 %vm63_vm0, %v35_v8  ;;  %341 = vmatprep.subr.msk.mxu1 %vm63_vm0, %v35_v8  ;;  %v28_v18 = vld [vmem:[%s573_s0 + $0x28] sm:$0xff]  ;;  %v27_v19 = vld [vmem:[%s573_s0 + $0x20] sm:$0xff]  ;;  %v26_v20 = vld [vmem:[%s573_s0 + $0x18] sm:$0xff]  ;;  %p378_p0 = scmp.ne.s32.totalorder %s253_s11, %s377_s2  ;;  %p382_p1 = scmp.lt.s32.totalorder %s253_s11, %s253_s11 }
   0xd   :  { %60 = vperm.xlu1 %374, %v42_v9   ;;  %50 = vperm.xlu0 %373, %v40_v10   ;;  %v25_v21 = vld [vmem:[%s573_s0 + $0x10] sm:$0xff]  ;;  %v24_v22 = vld [vmem:[%s573_s0 + $0x8] sm:$0xff]  ;;  %v23_v23 = vld [vmem:[%s573_s0] sm:$0xff]  ;;  %p383_p2 = scmp.lt.s32.totalorder %s381_s12, %s377_s2 }
   0xe   :  { %v20_v24 = vld [vmem:[%s574_s1 + $0x8] sm:$0xff]  ;;  %v22_v25 = vld [vmem:[%s574_s1 + $0x18] sm:$0xff] }
   0xf   :  { %307 = vmatpush3.xpose.msk.msra.mxu0 %vm63_vm0, %v35_v8  ;;  %357 = vmatpush3.xpose.msk.msra.mxu1 %vm63_vm0, %v35_v8  ;;  %p384_p3 = por %p383_p2, %p382_p1 }
  0x10   :  { %308 = vmatprep.subr.msk.mxu0 %vm63_vm0, %v34_v11  ;;  %342 = vmatprep.subr.msk.mxu1 %vm63_vm0, %v34_v11 }
  0x11   :  { %376 = vset.pattern.permute.xlu1 %v400_v13  ;;  %375 = vset.pattern.permute.xlu0 %v400_v13  ;;  %p385_p4 = pnand %p384_p3, %p378_p0 }
  0x12   :  { %218 = vperm.xlu1 %376, %v40_v10   ;;  %214 = vperm.xlu0 %375, %v39_v7  }
  0x13   :  { %309 = vmatpush3.xpose.msk.msra.mxu0 %vm63_vm0, %v34_v11  ;;  %358 = vmatpush3.xpose.msk.msra.mxu1 %vm63_vm0, %v34_v11 }
  0x14   :  { %310 = vmatprep.subr.msk.mxu0 %vm63_vm0, %v33_v12  ;;  %343 = vmatprep.subr.msk.mxu1 %vm63_vm0, %v33_v12 }
  0x16   :  { %222 = vperm.xlu1 %376, %v41_v6   ;;  %226 = vperm.xlu0 %375, %v42_v9  }
  0x17   :  { %311 = vmatpush3.xpose.msk.msra.mxu0 %vm63_vm0, %v33_v12  ;;  %359 = vmatpush3.xpose.msk.msra.mxu1 %vm63_vm0, %v33_v12 }
  0x18   :  { %312 = vmatprep.subr.msk.mxu0 %vm63_vm0, %v32_v14  ;;  %344 = vmatprep.subr.msk.mxu1 %vm63_vm0, %v32_v14 }
  0x1b   :  { %313 = vmatpush3.xpose.msk.msra.mxu0 %vm63_vm0, %v32_v14  ;;  %360 = vmatpush3.xpose.msk.msra.mxu1 %vm63_vm0, %v32_v14 }
  0x1c   :  { %314 = vmatprep.subr.msk.mxu0 %vm63_vm0, %v31_v15  ;;  %345 = vmatprep.subr.msk.mxu1 %vm63_vm0, %v31_v15 }
  0x1f   :  { %315 = vmatpush3.xpose.msk.msra.mxu0 %vm63_vm0, %v31_v15  ;;  %361 = vmatpush3.xpose.msk.msra.mxu1 %vm63_vm0, %v31_v15 }
  0x20   :  { %316 = vmatprep.subr.msk.mxu0 %vm63_vm0, %v30_v16  ;;  %346 = vmatprep.subr.msk.mxu1 %vm63_vm0, %v30_v16 }
  0x23   :  { %317 = vmatpush3.xpose.msk.msra.mxu0 %vm63_vm0, %v30_v16  ;;  %362 = vmatpush3.xpose.msk.msra.mxu1 %vm63_vm0, %v30_v16 }
  0x24   :  { %318 = vmatprep.subr.msk.mxu0 %vm63_vm0, %v29_v17  ;;  %347 = vmatprep.subr.msk.mxu1 %vm63_vm0, %v29_v17 }
  0x27   :  { %319 = vmatpush3.xpose.msk.msra.mxu0 %vm63_vm0, %v29_v17  ;;  %363 = vmatpush3.xpose.msk.msra.mxu1 %vm63_vm0, %v29_v17 }
  0x28   :  { %320 = vmatprep.subr.msk.mxu0 %vm63_vm0, %v28_v18  ;;  %348 = vmatprep.subr.msk.mxu1 %vm63_vm0, %v28_v18 }
  0x2b   :  { %321 = vmatpush3.xpose.msk.msra.mxu0 %vm63_vm0, %v28_v18  ;;  %364 = vmatpush3.xpose.msk.msra.mxu1 %vm63_vm0, %v28_v18 }
  0x2c   :  { %322 = vmatprep.subr.msk.mxu0 %vm63_vm0, %v27_v19  ;;  %349 = vmatprep.subr.msk.mxu1 %vm63_vm0, %v27_v19 }
  0x2f   :  { %323 = vmatpush3.xpose.msk.msra.mxu0 %vm63_vm0, %v27_v19  ;;  %365 = vmatpush3.xpose.msk.msra.mxu1 %vm63_vm0, %v27_v19 }
  0x30   :  { %324 = vmatprep.subr.msk.mxu0 %vm63_vm0, %v26_v20  ;;  %350 = vmatprep.subr.msk.mxu1 %vm63_vm0, %v26_v20 }
  0x33   :  { %325 = vmatpush3.xpose.msk.msra.mxu0 %vm63_vm0, %v26_v20  ;;  %366 = vmatpush3.xpose.msk.msra.mxu1 %vm63_vm0, %v26_v20 }
  0x34   :  { %326 = vmatprep.subr.msk.mxu0 %vm63_vm0, %v25_v21  ;;  %351 = vmatprep.subr.msk.mxu1 %vm63_vm0, %v25_v21 }
  0x37   :  { %327 = vmatpush3.xpose.msk.msra.mxu0 %vm63_vm0, %v25_v21  ;;  %367 = vmatpush3.xpose.msk.msra.mxu1 %vm63_vm0, %v25_v21 }
  0x38   :  { %328 = vmatprep.subr.msk.mxu0 %vm63_vm0, %v24_v22  ;;  %352 = vmatprep.subr.msk.mxu1 %vm63_vm0, %v24_v22 }
  0x3b   :  { %329 = vmatpush3.xpose.msk.msra.mxu0 %vm63_vm0, %v24_v22  ;;  %368 = vmatpush3.xpose.msk.msra.mxu1 %vm63_vm0, %v24_v22 }
  0x3c   :  { %330 = vmatprep.subr.msk.mxu0 %vm63_vm0, %v23_v23  ;;  %353 = vmatprep.subr.msk.mxu1 %vm63_vm0, %v23_v23 }
  0x3f   :  { %331 = vmatpush3.xpose.msk.msra.mxu0 %vm63_vm0, %v23_v23  ;;  %369 = vmatpush3.xpose.msk.msra.mxu1 %vm63_vm0, %v23_v23 }
  0x42   :  { %333 = vmatmul.mubr.msk.f32.vlgmr.msra.gmra.mxu0 %vm63_vm0, %v20_v24  ;;  %336 = vmatmul.mubr.msk.f32.vlgmr.msra.gmra.mxu1 %vm63_vm0, %v22_v25 }
  0x84   :  { %v56_v26 = vpop.permute.xlu1 %55  ;;  %v46_v27 = vpop.permute.xlu0 %45 }
  0x88   :  { %v61_v28 = vpop.permute.xlu1 %60  ;;  %v51_v29 = vpop.permute.xlu0 %50 }
  0x8d   :  { %v219_v32 = vpop.permute.xlu1 %218  ;;  %v215_v33 = vpop.permute.xlu0 %214 }
  0x91   :  { %v223_v46 = vpop.permute.xlu1 %222  ;;  %v227_v47 = vpop.permute.xlu0 %226 }
 0x102   :  { %v334_v30 = vpop.f32.mrf.mxu0  ;;  %v337_v31 = vpop.f32.mrf.mxu1 }
 0x103   :  { %v196_v34 = vadd.f32 %v334_v30, %v51_v29  ;;  %v206_v38 = vadd.f32 %v337_v31, %v61_v28 }
 0x104   :  { %v190_v35 = vpop.f32.mrf.mxu0  ;;  %v200_v36 = vpop.f32.mrf.mxu1 }
 0x105   :  { %v210_v37 = vmax.f32 %v196_v34, 0.0  ;;  %v191_v39 = vadd.f32 %v190_v35, %v46_v27  ;;  %v201_v40 = vadd.f32 %v200_v36, %v56_v26  ;;  %v212_v44 = vmax.f32 %v206_v38, 0.0 }
 0x107   :  { %v209_v41 = vmax.f32 %v191_v39, 0.0  ;;  %v211_v42 = vmax.f32 %v201_v40, 0.0  ;;  %v230_v43 = vmul.f32 %v219_v32, %v210_v37  ;;  %v232_v51 = vmul.f32 %v227_v47, %v212_v44 }
 0x109   :  { %v229_v45 = vmul.f32 %v215_v33, %v209_v41  ;;  %v231_v48 = vmul.f32 %v223_v46, %v211_v42 }
 0x10b   :  { %v233_v49 = vadd.f32 %v230_v43, %v229_v45 }
 0x10d   :  { %v234_v50 = vadd.f32 %v233_v49, %v231_v48 }
 0x10f   :  { %v235_v52 = vadd.f32 %v234_v50, %v232_v51 }
 0x111   :  { %v236_v53 = vrot.slane %v235_v52, 4 }
 0x113   :  { %v237_v54 = vadd.f32 %v236_v53, %v235_v52 }
 0x115   :  { %v238_v55 = vrot.slane %v237_v54, 2 }
 0x117   :  { %v239_v56 = vadd.f32 %v238_v55, %v237_v54 }
 0x119   :  { %v240_v57 = vrot.slane %v239_v56, 1 }
 0x11b   :  { %v241_v59 = vadd.f32 %v240_v57, %v239_v56 }
 0x11d   :  { %v244_v60 = vadd.f32 %v243_v58, %v241_v59 }
 0x11f   :  { %245 = vst [vmem:[#allocation3] sm:$0x1] %v244_v60 }
 0x120   :  { %388 = shalt.err (!%p385_p4)
}
 0x121   :  { %255 = dma.vmem_to_hbm [thread:$0]  %s253_s11, 16, %s577_s4, [#allocation4]  }
 0x122   :  { %397 = dma.done.wait [#allocation4], 16  }
 0x123   :  { %398 = vsyncadd [#allocation4], 4294967280 }
 0x124   :  { %259 = vsyncpa [#allocation4], 1 }

</bundles_post_ra>
